<compile_context>
chip_gen: v7x
topology: tpu7x:2x2x1
jax: 0.10.0
libtpu: 0.0.40
codegen_flags: <defaults>
</compile_context>

<pallas_src>
import functools

import jax
import jax.numpy as jnp
from jax.experimental import pallas as pl
from jax.experimental.pallas import tpu as pltpu


# ------------------------------ Pallas kernel -------------------------------

def _ru_kernel(x_ref, w_ref, b_ref, o_ref):
    # x_ref: [C, TL]  activation slab (channels on sublanes, spatial on lanes)
    # w_ref: [C, C]   folded effective weight (row = output channel), resident
    # b_ref: [C, 1]   folded effective bias (broadcast along lanes), resident
    acc = jnp.dot(w_ref[...], x_ref[...], preferred_element_type=jnp.float32)
    o_ref[...] = (acc + b_ref[...]).astype(o_ref.dtype)


# --------------------------- tile / VMEM selection ---------------------------

def _round_up(x, m):
    return ((x + m - 1) // m) * m


def _round_down(x, m):
    return (x // m) * m


def _select_spatial_tile(hw, n, c, elt_bytes):
    """Pick the lane-tile TL (multiple of 128) and a matching vmem limit."""
    # Generation-aware VMEM capacity (128 MiB v5e/v6e, 64 MiB per-TC v7x).
    try:
        vmem_cap = int(pltpu.get_tpu_info().vmem_capacity_bytes)
    except Exception:  # pragma: no cover - conservative fallback (v7x value)
        vmem_cap = 64 << 20

    weight_bytes = c * c * 4 + c * 4
    # Two pipelined buffers for each of (input tile, output tile).
    per_lane_bytes = 4 * c * elt_bytes
    budget = max(int(0.45 * vmem_cap) - weight_bytes, 128 * per_lane_bytes)
    tl_max = max(128, _round_down(budget // per_lane_bytes, 128))

    hw128 = _round_up(hw, 128)
    tl = min(tl_max, hw128)

    # v7x megacore: with batch == 1 make sure the spatial axis alone provides
    # >= 2 (ideally >= 4) parallel programs so both TensorCores get work.
    if n == 1 and hw128 >= 2 * 128:
        want = 4 if hw128 >= 4 * 128 else 2
        tl = min(tl, max(128, _round_down(hw128 // want, 128)))
    tl = max(tl, 128)

    # Explicit scoped-VMEM limit: needed bytes + slack, never above ~90% of the
    # physical capacity.  (v5e's 16 MiB default would otherwise throttle tiles.)
    need = 4 * c * tl * elt_bytes + weight_bytes + (2 << 20)
    vmem_limit = int(min(0.9 * vmem_cap, max(need, 16 << 20)))
    return tl, vmem_limit


# --------------------------------- wrapper -----------------------------------

def residual_unit(x_nchw, params, re_scale=(1.0, 1.0), donate_input=False):
    """x_nchw: [N, C, H, W].  params hold PyTorch-layout 1x1 conv weights."""
    lam_res, lam_x = float(re_scale[0]), float(re_scale[1])
    N, C, H, W = x_nchw.shape
    HW = H * W

    w_red, b_red = params["w_red"], params["b_red"]   # [C//2, C], [C//2]
    w_exp, b_exp = params["w_exp"], params["b_exp"]   # [C, C//2], [C]

    # Exact algebraic fold (no nonlinearity between the convs), done at trace
    # time in f32; lamRes/lamX are absorbed.
    w_eff = lam_x * jnp.eye(C, dtype=jnp.float32) + lam_res * (
        w_exp.astype(jnp.float32) @ w_red.astype(jnp.float32))          # [C, C]
    b_eff = (lam_res * (w_exp.astype(jnp.float32) @ b_red.astype(jnp.float32)
                        + b_exp.astype(jnp.float32))).reshape(C, 1)     # [C, 1]
    # Match the activation dtype on the MXU path (f32 in, f32 weight; bf16 in,
    # bf16 weight) while always accumulating in f32 inside the kernel.
    w_eff = w_eff.astype(x_nchw.dtype)

    x3 = x_nchw.reshape(N, C, HW)   # NCHW is already a [C, HW] slab per batch
    elt_bytes = jnp.dtype(x_nchw.dtype).itemsize
    TL, vmem_limit = _select_spatial_tile(HW, N, C, elt_bytes)

    grid = (N, pl.cdiv(HW, TL))     # boundary tile (if any) is masked by Pallas

    out = pl.pallas_call(
        _ru_kernel,
        out_shape=jax.ShapeDtypeStruct((N, C, HW), x_nchw.dtype),
        grid=grid,
        in_specs=[
            pl.BlockSpec((None, C, TL), lambda n, j: (n, 0, j)),  # activation
            pl.BlockSpec((C, C), lambda n, j: (0, 0)),            # folded weight
            pl.BlockSpec((C, 1), lambda n, j: (0, 0)),            # folded bias
        ],
        out_specs=pl.BlockSpec((None, C, TL), lambda n, j: (n, 0, j)),
        compiler_params=pltpu.CompilerParams(
            dimension_semantics=("parallel", "parallel"),
            vmem_limit_bytes=vmem_limit),
        # Optional in-place update (each tile is read before it is written);
        # only useful when the caller can actually donate the activation buffer
        # (e.g. stacked ESRT units) -- otherwise XLA inserts a defensive copy.
        input_output_aliases=({0: 0} if donate_input else {}),
    )(x3, w_eff, b_eff)
    return out.reshape(N, C, H, W)


# --------------------------- pure-JAX reference ------------------------------

def residual_unit_ref(x_nchw, params, re_scale=(1.0, 1.0)):
    lam_res, lam_x = re_scale
    r = (jnp.einsum("oc,nchw->nohw", params["w_red"], x_nchw)
         + params["b_red"][None, :, None, None])
    e = (jnp.einsum("oc,nchw->nohw", params["w_exp"], r)
         + params["b_exp"][None, :, None, None])
    return lam_x * x_nchw + lam_res * e


# ------------------------------ parameter init -------------------------------

def init_params(key, in_channels, out_channels, scale=0.05):
    k1, k2, k3, k4 = jax.random.split(key, 4)
    mid = out_channels // 2
    return {
        "w_red": scale * jax.random.normal(k1, (mid, in_channels), jnp.float32),
        "b_red": scale * jax.random.normal(k2, (mid,), jnp.float32),
        "w_exp": scale * jax.random.normal(k3, (in_channels, mid), jnp.float32),
        "b_exp": scale * jax.random.normal(k4, (in_channels,), jnp.float32),
    }


# ----------------------------------- main ------------------------------------

if __name__ == "__main__":
    N, C, H, W = 2, 16, 16, 16          # inChannel == outChannel == 16
    key = jax.random.PRNGKey(0)
    kx, kp = jax.random.split(key)

    x = jax.random.normal(kx, (N, C, H, W), jnp.float32)   # NCHW, PyTorch layout
    params = init_params(kp, C, C)
    re_scale = (0.5, 1.0)               # (lamRes, lamX)

    fwd = jax.jit(functools.partial(residual_unit, re_scale=re_scale))
    out = jax.block_until_ready(fwd(x, params))

    ref = residual_unit_ref(x, params, re_scale)
    assert out.shape == x.shape and out.dtype == x.dtype
    assert jnp.allclose(out, ref, rtol=1e-2, atol=1e-2), \
        float(jnp.max(jnp.abs(out - ref)))
    print("KERNEL_OK")
</pallas_src>

<mosaic_0001>
module attributes {stable_mosaic.version = 11 : i64} {
  func.func @_ru_kernel(%arg0: i32, %arg1: i32, %arg2: memref<1x16x256xf32, #tpu.memory_space<vmem>>, %arg3: memref<16x16xf32, #tpu.memory_space<vmem>>, %arg4: memref<16x1xf32, #tpu.memory_space<vmem>>, %arg5: memref<1x16x256xf32, #tpu.memory_space<vmem>>) attributes {dimension_semantics = [#tpu.dimension_semantics<parallel>, #tpu.dimension_semantics<parallel>], iteration_bounds = array<i64: 2, 1>, scalar_prefetch = 0 : i64, scratch_operands = 0 : i64, tpu.core_type = #tpu.core_type<tc>, window_params = [{transform_indices = @transform_0, window_bounds = array<i64: 1, 16, 256>}, {pipeline_mode = #tpu.pipeline_mode<synchronous>, transform_indices = @transform_1, window_bounds = array<i64: 16, 16>}, {pipeline_mode = #tpu.pipeline_mode<synchronous>, transform_indices = @transform_2, window_bounds = array<i64: 16, 1>}, {transform_indices = @transform_3, window_bounds = array<i64: 1, 16, 256>}]} {
    %c0 = arith.constant 0 : index
    %c0_0 = arith.constant 0 : index
    %0 = vector.load %arg3[%c0, %c0_0] : memref<16x16xf32, #tpu.memory_space<vmem>>, vector<16x16xf32>
    %c0_1 = arith.constant 0 : index
    %c0_2 = arith.constant 0 : index
    %c0_3 = arith.constant 0 : index
    %1 = vector.load %arg2[%c0_1, %c0_2, %c0_3] : memref<1x16x256xf32, #tpu.memory_space<vmem>>, vector<1x16x256xf32>
    %2 = vector.shape_cast %1 : vector<1x16x256xf32> to vector<16x256xf32>
    %cst = arith.constant dense<0.000000e+00> : vector<16x256xf32>
    %3 = tpu.matmul %0, %2, %cst {dimension_numbers = #tpu.dot_dimension_numbers<[1], [0], [0], [1], [0, 0, 1, 1], [], []>} : vector<16x16xf32>, vector<16x256xf32>, vector<16x256xf32> -> vector<16x256xf32>
    %c0_4 = arith.constant 0 : index
    %c0_5 = arith.constant 0 : index
    %4 = vector.load %arg4[%c0_4, %c0_5] : memref<16x1xf32, #tpu.memory_space<vmem>>, vector<16x1xf32>
    %5 = vector.broadcast %4 : vector<16x1xf32> to vector<16x256xf32>
    %6 = arith.addf %3, %5 : vector<16x256xf32>
    %c0_6 = arith.constant 0 : index
    %c0_7 = arith.constant 0 : index
    %c0_8 = arith.constant 0 : index
    %7 = vector.load %arg5[%c0_6, %c0_7, %c0_8] : memref<1x16x256xf32, #tpu.memory_space<vmem>>, vector<1x16x256xf32>
    %8 = vector.shape_cast %7 : vector<1x16x256xf32> to vector<16x256xf32>
    %9 = vector.shape_cast %6 : vector<16x256xf32> to vector<1x16x256xf32>
    tpu.vector_store %arg5[%c0_6, %c0_7, %c0_8], %9 {strides = array<i32>} : memref<1x16x256xf32, #tpu.memory_space<vmem>>, vector<1x16x256xf32>,
    return
  }
  func.func @transform_0(%arg0: i32, %arg1: i32) -> (i32, i32, i32) {
    %c0_i32 = arith.constant 0 : i32
    %c0_i32_0 = arith.constant 0 : i32
    return %arg0, %c0_i32, %arg1 : i32, i32, i32
  }
  func.func @transform_1(%arg0: i32, %arg1: i32) -> (i32, i32) {
    %c0_i32 = arith.constant 0 : i32
    %c0_i32_0 = arith.constant 0 : i32
    %c0_i32_1 = arith.constant 0 : i32
    return %c0_i32, %c0_i32_0 : i32, i32
  }
  func.func @transform_2(%arg0: i32, %arg1: i32) -> (i32, i32) {
    %c0_i32 = arith.constant 0 : i32
    %c0_i32_0 = arith.constant 0 : i32
    %c0_i32_1 = arith.constant 0 : i32
    return %c0_i32, %c0_i32_0 : i32, i32
  }
  func.func @transform_3(%arg0: i32, %arg1: i32) -> (i32, i32, i32) {
    %c0_i32 = arith.constant 0 : i32
    %c0_i32_0 = arith.constant 0 : i32
    return %arg0, %c0_i32, %arg1 : i32, i32, i32
  }
}

</mosaic_0001>

<bundles_post_ra>
// kernel: residual_unit.1
= control target key start
LH: loop header
LB: loop body
LE: loop exit
PB: predicated region body
PF: predicated region fallthrough
CT: control target
= control target key end

     0   :  { %s497_s12 = smov 0   ;;  %s499_s13 = smov 0   ;;  %s542_s0 = inlined_call_operand.vmem [shape: f32[2,16,256], index: 0, kind: input, shape index: {}]   ;;  %s543_s1 = inlined_call_operand.vmem [shape: f32[16,16], index: 1, kind: input, shape index: {}]   ;;  %s544_s2 = inlined_call_operand.vmem [shape: f32[16,1], index: 2, kind: input, shape index: {}]   ;;  %s545_s3 = inlined_call_operand.vmem [shape: f32[2,16,256], index: 3, kind: output, shape index: {}]  }
   0x1   :  { %s501_s14 = smov 0  }
   0x2 LB: > { %s25_s15 = sadd.s32 1, %s469_s13  ;;  %p407_p0 = scmp.ge.s32.totalorder %s473_s14, 1  ;;  %s473_s14 = sphi %s501_s14, %s13_s14   ;;  %s469_s13 = sphi %s499_s13, %s547_s13   ;;  %s465_s12 = sphi %s497_s12, %s546_s12  }
   0x3   : > { %p27_p1 = scmp.ge.s32.totalorder %s25_s15, 2  ;;  %p158_p2 = scmp.lt.s32.totalorder %s473_s14, 3 }
   0x5   : > { %s549_s15 = smov (%p27_p1, %s25_s15), 0  ;;  %p159_p3 = pnand %p407_p0, %p158_p2 }
   0x6   : > { %p191_p4 = scmp.lt.s32.totalorder (!%p159_p3), %s465_s12, 1  ;;  %v475_v0 = vmov (!%p159_p3), 0.0   ;;  %v216_v1 = vld [vmem:[%s544_s2] sm:$0xff] (!%p159_p3)  ;;  %v476_v2 = vmov (!%p159_p3), 0   ;;  %v217_v3 = vld [vmem:[%s544_s2 + $0x8] sm:$0xff] (!%p159_p3)  ;;  %vm228_vm0 = vcmask (!%p159_p3), 130048  }
   0x7   : > { %162 = sbr.rel (%p159_p3) target bundleno = 240 (0xf0), region = 32  ;;  %299 = vmatprep.mubr.f32.mxu0 (!%p159_p3), %v475_v0  ;;  %305 = vmatprep.mubr.f32.mxu1 (!%p159_p3), %v475_v0  ;;  %v210_v10 = vld [vmem:[%s543_s1] sm:$0xff] (!%p159_p3)  ;;  %v211_v11 = vld [vmem:[%s543_s1 + $0x8] sm:$0xff] (!%p159_p3) }
   0x8   : > { %450 = vset.pattern.permute.xlu0 (!%p159_p3), %v476_v2 }
   0x9   : > { %220 = vperm.xlu0 (!%p159_p3), %450, %v216_v1  }
   0xd   : > { %225 = vperm.xlu0 (!%p159_p3), %450, %v217_v3  }
   0xe   : > { %s551_s12 = smov (!%p191_p4, %s465_s12), 1 }
   0xf   : > { %s416_s18 = sshll.u32 %s551_s12, 5 }
  0x10   : > { %s198_s23 = scalar_lea.vmem %s542_s0, %s416_s18  ;;  %s208_s30 = scalar_lea.vmem %s545_s3, %s416_s18 }
  0x11   : > { %v213_v4 = vld [vmem:[%s198_s23 + $0x8] sm:$0xff]  ;;  %v215_v5 = vld [vmem:[%s198_s23 + $0x18] sm:$0xff]  ;;  %v212_v6 = vld [vmem:[%s198_s23] sm:$0xff] }
  0x12   : > { %v418_v7 = vpack.c.bf16 %v215_v5, %v213_v4  ;;  %v214_v8 = vld [vmem:[%s198_s23 + $0x10] sm:$0xff] }
  0x13   : > { %v420_v9 = vpack.c.bf16 %v214_v8, %v212_v6 }
  0x14   : > { %419 = vmatprep.subr.bf16.mxu0 %v418_v7  ;;  %422 = vmatprep.subr.bf16.mxu1 %v418_v7 }
  0x15   : > { %421 = vmatpush1.bf16.msra.mxu0 %v420_v9  ;;  %423 = vmatpush1.bf16.msra.mxu1 %v420_v9 }
  0x18   : > { %412 = vmatmul.mubr.msk.f32.vlgmr.msra.gmra.mrb[0].mxu0 %vm228_vm0, %v210_v10  ;;  %413 = vmatmul.mubr.msk.f32.vlgmr.msra.gmra.mrb[0].mxu1 %vm228_vm0, %v211_v11 }
  0x88   : > { %v221_v12 = vpop.permute.xlu0 %220 }
  0x8c   : > { %v226_v13 = vpop.permute.xlu0 %225 }
  0xeb   : > { %v301_v14 = vpop.f32.mrb[0].mxu0  ;;  %v307_v15 = vpop.f32.mrb[0].mxu1 }
  0xec   : > { %v302_v16 = vadd.f32 %v301_v14, %v221_v12  ;;  %v308_v17 = vadd.f32 %v307_v15, %v226_v13  ;;  %v303_v18 = vpop.f32.mrb[1].mxu0  ;;  %v309_v19 = vpop.f32.mrb[1].mxu1 }
  0xed   : > { %v304_v20 = vadd.f32 %v303_v18, %v221_v12  ;;  %v310_v21 = vadd.f32 %v309_v19, %v226_v13 }
  0xee   : > { %312 = vst [vmem:[%s208_s30] sm:$0xff] %v302_v16  ;;  %314 = vst [vmem:[%s208_s30 + $0x10] sm:$0xff] %v308_v17 }
  0xef   : > { %313 = vst [vmem:[%s208_s30 + $0x8] sm:$0xff] %v304_v20  ;;  %315 = vst [vmem:[%s208_s30 + $0x18] sm:$0xff] %v310_v21 }
  0xf0 PF: > { %s13_s14 = sadd.s32 1, %s473_s14   ;;  %s546_s12 = smov %s469_s13 }
  0xf1   : > { %p10_p5 = scmp.ge.s32.totalorder %s13_s14, 4   ;;  %s547_s13 = smov %s549_s15 }
  0xf3   :  { %12 = sbr.rel (!%p10_p5) target bundleno = 2 (0x2), region = 62 }

</bundles_post_ra>
